<compile_context>
chip_gen: v7x
topology: tpu7x:2x2x1
jax: 0.10.0
libtpu: 0.0.40
codegen_flags: <defaults>
</compile_context>

<pallas_src>
import math
import functools

import jax
import jax.numpy as jnp
from jax.experimental import pallas as pl
from jax.experimental.pallas import tpu as pltpu


# ------------------------- generation-aware sizing --------------------------

def _vmem_capacity_bytes():
    try:
        cap = getattr(pltpu.get_tpu_info(), "vmem_capacity_bytes", None)
        if cap:
            return int(cap)
    except Exception:
        pass
    return 128 * 1024 * 1024            # v5e / v6e default


_VMEM_CAP = _vmem_capacity_bytes()
_SMALL_VMEM = _VMEM_CAP < 100 * 1024 * 1024       # v7x-class (64 MiB per TC)
# Tile targets (bf16 streamed operands, f32 accumulators). Larger on the
# 128-MiB parts (v5e/v6e) to cut grid-step overhead and weight re-streaming,
# tighter on v7x so double-buffering survives inside 64 MiB.
_TM = 256
_TN = 256 if _SMALL_VMEM else 512
_TK = 512 if _SMALL_VMEM else 1024
_VMEM_LIMIT = int(min(_VMEM_CAP * 3 // 8, 48 * 1024 * 1024))


def _pick_tile(dim, target, align):
    """Largest multiple of `align` <= target that divides dim; else full dim.
    Note: the full-dim fallback can exceed the VMEM budget for awkward shapes;
    real BERT dims (multiples of 128) always find an aligned divisor."""
    if dim <= target:
        return dim                      # full-extent block is always legal
    t = (min(target, dim) // align) * align
    while t >= align:
        if dim % t == 0:
            return t
        t -= align
    return dim


# ----------------------------- Pallas kernels -------------------------------

def _linear_kernel(x_ref, w_ref, b_ref, o_ref, acc_ref, *, activation):
    """Tiled (tm,tk)x(tk,tn) bf16 matmul, f32 accumulate, bias (+tanh-GELU)."""
    @pl.when(pl.program_id(2) == 0)
    def _():
        acc_ref[...] = jnp.zeros_like(acc_ref)

    acc_ref[...] += jnp.dot(x_ref[...], w_ref[...],
                            preferred_element_type=jnp.float32)

    @pl.when(pl.program_id(2) == pl.num_programs(2) - 1)
    def _():
        h = acc_ref[...] + b_ref[...]
        if activation == "gelu":        # tanh approx == F.gelu(approximate=True)
            c = math.sqrt(2.0 / math.pi)
            h = 0.5 * h * (1.0 + jnp.tanh(c * (h + 0.044715 * h * h * h)))
        o_ref[...] = h.astype(o_ref.dtype)


def _linear_res_ln_kernel(x_ref, w_ref, b_ref, res_ref, g_ref, bb_ref,
                          o_ref, acc_ref, *, eps):
    """Tiled matmul with fused (bias + residual + LayerNorm) epilogue.

    N is kept as the full hidden dim per block so the row mean/var are exact.
    """
    @pl.when(pl.program_id(1) == 0)
    def _():
        acc_ref[...] = jnp.zeros_like(acc_ref)

    acc_ref[...] += jnp.dot(x_ref[...], w_ref[...],
                            preferred_element_type=jnp.float32)

    @pl.when(pl.program_id(1) == pl.num_programs(1) - 1)
    def _():
        h = acc_ref[...] + b_ref[...] + res_ref[...].astype(jnp.float32)
        mu = jnp.mean(h, axis=-1, keepdims=True)
        var = jnp.mean((h - mu) ** 2, axis=-1, keepdims=True)
        o_ref[...] = ((h - mu) * jax.lax.rsqrt(var + eps)
                      * g_ref[...] + bb_ref[...]).astype(o_ref.dtype)


def _attention_kernel(qkv_ref, m_ref, o_ref, *, num_heads, head_dim, scale):
    """One batch element per grid step.

    Blocks: qkv (1, S, 3H) bf16 (lane-dense), mask (1, 1, S) additive f32,
    out (1, S, H) bf16 (lane-dense).  Heads are split in-kernel (VMEM work);
    the mask is never materialized at (B*nh, S, S).
    """
    H = num_heads * head_dim
    qkv = qkv_ref[0]                                   # (S, 3H) bf16
    mask = m_ref[0]                                    # (1, S) f32
    # Fold 1/sqrt(d) into q: one pass over (S, H) instead of (nh, S, S).
    q_all = (qkv[:, 0:H].astype(jnp.float32) * scale).astype(jnp.bfloat16)
    k_all = qkv[:, H:2 * H]
    v_all = qkv[:, 2 * H:3 * H]

    ctx_parts = []
    for h in range(num_heads):                         # static unroll over heads
        lo, hi = h * head_dim, (h + 1) * head_dim
        q_h, k_h, v_h = q_all[:, lo:hi], k_all[:, lo:hi], v_all[:, lo:hi]
        # Q.K^T via dot_general (contract on d) -- no K transpose copy.
        s = jax.lax.dot_general(q_h, k_h, (((1,), (1,)), ((), ())),
                                preferred_element_type=jnp.float32)   # (S, S)
        s = s + mask                                   # bcast over query rows
        s = s - jnp.max(s, axis=-1, keepdims=True)
        p = jnp.exp(s)
        p = p * pl.reciprocal(jnp.sum(p, axis=-1, keepdims=True), approx=True)
        ctx_parts.append(
            jnp.dot(p.astype(jnp.bfloat16), v_h,
                    preferred_element_type=jnp.float32).astype(o_ref.dtype))
    # Single lane-dense (S, H) store.
    o_ref[0] = jnp.concatenate(ctx_parts, axis=-1)
    # TODO(synk): flash-style KV tiling (grid over (B, head-block, S/tq) with
    # m/l/acc VMEM scratch) for long sequences so the (S, S) scores never
    # exceed v7x's 64 MiB VMEM and DMA overlaps compute within a batch element.


# ----------------------------- Pallas wrappers ------------------------------

def pallas_linear(x, w, b, activation=None, out_dtype=jnp.bfloat16):
    x = x.astype(jnp.bfloat16)
    w = w.astype(jnp.bfloat16)
    M, K = x.shape
    N = w.shape[1]
    tm = _pick_tile(M, _TM, 16)
    tn = _pick_tile(N, _TN, 128)
    tk = _pick_tile(K, _TK, 128)
    grid = (M // tm, N // tn, K // tk)
    return pl.pallas_call(
        functools.partial(_linear_kernel, activation=activation),
        out_shape=jax.ShapeDtypeStruct((M, N), out_dtype),
        grid=grid,
        in_specs=[pl.BlockSpec((tm, tk), lambda i, j, k: (i, k)),
                  pl.BlockSpec((tk, tn), lambda i, j, k: (k, j)),
                  pl.BlockSpec((1, tn), lambda i, j, k: (0, j))],
        out_specs=pl.BlockSpec((tm, tn), lambda i, j, k: (i, j)),
        scratch_shapes=[pltpu.VMEM((tm, tn), jnp.float32)],
        compiler_params=pltpu.CompilerParams(
            dimension_semantics=("parallel", "parallel", "arbitrary"),
            vmem_limit_bytes=_VMEM_LIMIT),
        cost_estimate=pl.CostEstimate(
            flops=2 * M * N * K + M * N,
            transcendentals=(M * N if activation == "gelu" else 0),
            bytes_accessed=2 * (M * K + K * N + M * N) + 4 * N),
    )(x, w, b.astype(jnp.float32).reshape(1, N))


def pallas_linear_residual_layernorm(x, w, b, residual, gamma, beta,
                                     eps=1e-12, out_dtype=jnp.bfloat16):
    x = x.astype(jnp.bfloat16)
    w = w.astype(jnp.bfloat16)
    M, K = x.shape
    N = w.shape[1]
    tm = _pick_tile(M, _TM, 16)
    tk = _pick_tile(K, _TK, 128)
    grid = (M // tm, K // tk)
    # TODO(synk): for very large hidden sizes on v7x, tile N and do a two-pass
    # LayerNorm (partial sum / sum-of-squares in scratch) instead of keeping
    # the full row resident per block.
    return pl.pallas_call(
        functools.partial(_linear_res_ln_kernel, eps=eps),
        out_shape=jax.ShapeDtypeStruct((M, N), out_dtype),
        grid=grid,
        in_specs=[pl.BlockSpec((tm, tk), lambda i, k: (i, k)),
                  pl.BlockSpec((tk, N), lambda i, k: (k, 0)),
                  pl.BlockSpec((1, N), lambda i, k: (0, 0)),
                  pl.BlockSpec((tm, N), lambda i, k: (i, 0)),
                  pl.BlockSpec((1, N), lambda i, k: (0, 0)),
                  pl.BlockSpec((1, N), lambda i, k: (0, 0))],
        out_specs=pl.BlockSpec((tm, N), lambda i, k: (i, 0)),
        scratch_shapes=[pltpu.VMEM((tm, N), jnp.float32)],
        compiler_params=pltpu.CompilerParams(
            dimension_semantics=("parallel", "arbitrary"),
            vmem_limit_bytes=_VMEM_LIMIT),
        cost_estimate=pl.CostEstimate(
            flops=2 * M * N * K + 8 * M * N,
            transcendentals=M,
            bytes_accessed=2 * (M * K + K * N + 2 * M * N) + 4 * (M * N + 3 * N)),
    )(x, w, b.astype(jnp.float32).reshape(1, N),
      residual.astype(jnp.bfloat16),
      gamma.astype(jnp.float32).reshape(1, N),
      beta.astype(jnp.float32).reshape(1, N))


def pallas_attention(qkv, mask, num_heads, head_dim, scale,
                     out_dtype=jnp.bfloat16):
    """qkv: (B, S, 3H) bf16 lane-dense; mask: (B, 1, S) additive f32."""
    B, S, H3 = qkv.shape
    H = num_heads * head_dim
    return pl.pallas_call(
        functools.partial(_attention_kernel, num_heads=num_heads,
                          head_dim=head_dim, scale=scale),
        out_shape=jax.ShapeDtypeStruct((B, S, H), out_dtype),
        grid=(B,),
        in_specs=[pl.BlockSpec((1, S, H3), lambda b: (b, 0, 0)),
                  pl.BlockSpec((1, 1, S), lambda b: (b, 0, 0))],
        out_specs=pl.BlockSpec((1, S, H), lambda b: (b, 0, 0)),
        compiler_params=pltpu.CompilerParams(
            dimension_semantics=("parallel",),
            vmem_limit_bytes=_VMEM_LIMIT),
        cost_estimate=pl.CostEstimate(
            flops=4 * B * num_heads * S * S * head_dim,
            transcendentals=B * num_heads * S * S,
            bytes_accessed=2 * (B * S * H3 + B * S * H) + 4 * B * S),
    )(qkv, mask)


# ----------------------------- BertLayer forward ----------------------------

def prepare_params(params):
    """One-time param prep: fuse QKV weights/biases, cast streamed weights to
    bf16 (halves HBM bytes and VMEM tile footprint); small vectors stay f32."""
    p = {}
    p['wqkv'] = jnp.concatenate(
        [params['wq'], params['wk'], params['wv']], axis=1).astype(jnp.bfloat16)
    p['bqkv'] = jnp.concatenate(
        [params['bq'], params['bk'], params['bv']], axis=0).astype(jnp.float32)
    p['wo'] = params['wo'].astype(jnp.bfloat16)
    p['wi'] = params['wi'].astype(jnp.bfloat16)
    p['wo2'] = params['wo2'].astype(jnp.bfloat16)
    for name in ('bo', 'ln1_g', 'ln1_b', 'bi', 'bo2', 'ln2_g', 'ln2_b'):
        p[name] = params[name].astype(jnp.float32)
    return p


def bert_layer_forward(hidden_states, attention_mask, prepped, num_heads):
    """hidden_states: (S, B, H) f32; attention_mask: (B, 1, 1, S) additive."""
    S, B, H = hidden_states.shape
    d = H // num_heads
    M = B * S

    # Single layout change to batch-major + bf16 cast (fused by XLA); every
    # downstream tensor is lane-dense (last dim H / 3H / I) and stays bf16.
    x = hidden_states.astype(jnp.bfloat16).transpose(1, 0, 2).reshape(M, H)

    # Fused QKV projection: x read from HBM once, one wide MXU pass.
    qkv = pallas_linear(x, prepped['wqkv'], prepped['bqkv'])      # (M, 3H) bf16
    qkv = qkv.reshape(B, S, 3 * H)                                # free reshape

    # Additive mask kept as (B, 1, S); broadcast happens inside the kernel.
    mask = attention_mask.reshape(B, 1, S).astype(jnp.float32)
    ctx = pallas_attention(qkv, mask, num_heads, d, 1.0 / math.sqrt(d))
    ctx = ctx.reshape(M, H)                                       # free reshape

    # BertSelfOutput: dense + (dropout=id) + residual + LayerNorm, fused.
    attn_out = pallas_linear_residual_layernorm(
        ctx, prepped['wo'], prepped['bo'], x,
        prepped['ln1_g'], prepped['ln1_b'])                       # (M, H) bf16

    # BertIntermediate: dense + gelu(tanh approx), fused.
    inter = pallas_linear(attn_out, prepped['wi'], prepped['bi'],
                          activation="gelu")                       # (M, I) bf16

    # BertOutput: dense + (dropout=id) + residual + LayerNorm, fused; f32 out.
    out = pallas_linear_residual_layernorm(
        inter, prepped['wo2'], prepped['bo2'], attn_out,
        prepped['ln2_g'], prepped['ln2_b'], out_dtype=jnp.float32)

    # Back to the module's seq-first layout.
    return out.reshape(B, S, H).transpose(1, 0, 2)


# ----------------------------- pure-JAX reference ---------------------------

def bert_layer_reference(hidden_states, attention_mask, params, num_heads):
    S, B, H = hidden_states.shape
    d = H // num_heads
    x = hidden_states.reshape(S * B, H)

    def lin(t, w, b):
        return t @ w + b

    def ln(t, g, bta):
        mu = jnp.mean(t, axis=-1, keepdims=True)
        var = jnp.mean((t - mu) ** 2, axis=-1, keepdims=True)
        return (t - mu) / jnp.sqrt(var + 1e-12) * g + bta

    q = lin(x, params['wq'], params['bq']).reshape(S, B, num_heads, d)
    k = lin(x, params['wk'], params['bk']).reshape(S, B, num_heads, d)
    v = lin(x, params['wv'], params['bv']).reshape(S, B, num_heads, d)
    q = q.transpose(1, 2, 0, 3)
    k = k.transpose(1, 2, 0, 3)
    v = v.transpose(1, 2, 0, 3)
    scores = jnp.einsum('bhqd,bhkd->bhqk', q, k) / math.sqrt(d)
    scores = scores + attention_mask
    probs = jax.nn.softmax(scores, axis=-1)
    ctx = jnp.einsum('bhqk,bhkd->bhqd', probs, v)
    ctx = ctx.transpose(2, 0, 1, 3).reshape(S * B, H)

    attn_out = ln(lin(ctx, params['wo'], params['bo']) + x,
                  params['ln1_g'], params['ln1_b'])
    inter = jax.nn.gelu(lin(attn_out, params['wi'], params['bi']),
                        approximate=True)
    out = ln(lin(inter, params['wo2'], params['bo2']) + attn_out,
             params['ln2_g'], params['ln2_b'])
    return out.reshape(S, B, H)


# --------------------------------- main --------------------------------------

if __name__ == "__main__":
    # config: hidden=32, heads=4 (head_dim=8), intermediate=128, seq=8, batch=2
    S, B, H = 8, 2, 32
    NH = 4
    I = 4 * H

    key = jax.random.PRNGKey(0)
    keys = jax.random.split(key, 16)

    def w(k, shape, scale=0.05):
        return (scale * jax.random.normal(k, shape)).astype(jnp.float32)

    params = {
        'wq': w(keys[0], (H, H)), 'bq': w(keys[1], (H,)),
        'wk': w(keys[2], (H, H)), 'bk': w(keys[3], (H,)),
        'wv': w(keys[4], (H, H)), 'bv': w(keys[5], (H,)),
        'wo': w(keys[6], (H, H)), 'bo': w(keys[7], (H,)),
        'ln1_g': jnp.ones((H,), jnp.float32), 'ln1_b': jnp.zeros((H,), jnp.float32),
        'wi': w(keys[8], (H, I)), 'bi': w(keys[9], (I,)),
        'wo2': w(keys[10], (I, H)), 'bo2': w(keys[11], (H,)),
        'ln2_g': jnp.ones((H,), jnp.float32), 'ln2_b': jnp.zeros((H,), jnp.float32),
    }

    hidden_states = jax.random.normal(keys[12], (S, B, H), dtype=jnp.float32)

    # additive attention mask (B, 1, 1, S): 0 for valid, -10000 for padded keys
    lengths = jnp.array([S, S - 2])
    key_pos = jnp.arange(S)[None, :]
    attention_mask = jnp.where(key_pos < lengths[:, None], 0.0, -10000.0)
    attention_mask = attention_mask.reshape(B, 1, 1, S).astype(jnp.float32)

    prepped = prepare_params(params)        # one-time: bf16 weights, fused QKV
    out = bert_layer_forward(hidden_states, attention_mask, prepped, NH)
    out = jax.block_until_ready(out)

    ref = bert_layer_reference(hidden_states, attention_mask, params, NH)
    assert out.shape == (S, B, H)
    # bf16 streamed operands / f32 accumulate vs the pure-f32 reference.
    assert jnp.allclose(out, ref, rtol=5e-2, atol=5e-2), \
        f"max abs err {jnp.max(jnp.abs(out - ref))}"

    print("KERNEL_OK")
</pallas_src>

<mosaic_0001>
module attributes {stable_mosaic.version = 11 : i64} {
  func.func @_linear_kernel(%arg0: i32, %arg1: i32, %arg2: i32, %arg3: memref<16x32xbf16, #tpu.memory_space<vmem>>, %arg4: memref<32x96xbf16, #tpu.memory_space<vmem>>, %arg5: memref<1x96xf32, #tpu.memory_space<vmem>>, %arg6: memref<16x96xbf16, #tpu.memory_space<vmem>>, %arg7: memref<16x96xf32, #tpu.memory_space<vmem>>) attributes {dimension_semantics = [#tpu.dimension_semantics<parallel>, #tpu.dimension_semantics<parallel>, #tpu.dimension_semantics<arbitrary>], iteration_bounds = array<i64: 1, 1, 1>, scalar_prefetch = 0 : i64, scratch_operands = 1 : i64, tpu.core_type = #tpu.core_type<tc>, window_params = [{transform_indices = @transform_0, window_bounds = array<i64: 16, 32>}, {transform_indices = @transform_1, window_bounds = array<i64: 32, 96>}, {transform_indices = @transform_2, window_bounds = array<i64: 1, 96>}, {transform_indices = @transform_3, window_bounds = array<i64: 16, 96>}]} {
    %c0_i32 = arith.constant 0 : i32
    %0 = arith.cmpi eq, %arg2, %c0_i32 : i32
    %1 = arith.extui %0 : i1 to i32
    %c0_i32_0 = arith.constant 0 : i32
    %2 = arith.cmpi ne, %1, %c0_i32_0 : i32
    scf.if %2 {
      %cst_10 = arith.constant 0.000000e+00 : f32
      %12 = vector.broadcast %cst_10 : f32 to vector<16x96xf32>
      %c0_11 = arith.constant 0 : index
      %c0_12 = arith.constant 0 : index
      %13 = vector.load %arg7[%c0_11, %c0_12] : memref<16x96xf32, #tpu.memory_space<vmem>>, vector<16x96xf32>
      tpu.vector_store %arg7[%c0_11, %c0_12], %12 {strides = array<i32>} : memref<16x96xf32, #tpu.memory_space<vmem>>, vector<16x96xf32>,
    } else {
    }
    %c0 = arith.constant 0 : index
    %c0_1 = arith.constant 0 : index
    %3 = vector.load %arg7[%c0, %c0_1] : memref<16x96xf32, #tpu.memory_space<vmem>>, vector<16x96xf32>
    %c0_2 = arith.constant 0 : index
    %c0_3 = arith.constant 0 : index
    %4 = vector.load %arg3[%c0_2, %c0_3] : memref<16x32xbf16, #tpu.memory_space<vmem>>, vector<16x32xbf16>
    %c0_4 = arith.constant 0 : index
    %c0_5 = arith.constant 0 : index
    %5 = vector.load %arg4[%c0_4, %c0_5] : memref<32x96xbf16, #tpu.memory_space<vmem>>, vector<32x96xbf16>
    %cst = arith.constant dense<0.000000e+00> : vector<16x96xf32>
    %6 = tpu.matmul %4, %5, %cst {dimension_numbers = #tpu.dot_dimension_numbers<[1], [0], [0], [1], [0, 0, 1, 1], [], []>} : vector<16x32xbf16>, vector<32x96xbf16>, vector<16x96xf32> -> vector<16x96xf32>
    %7 = arith.addf %3, %6 : vector<16x96xf32>
    %c0_6 = arith.constant 0 : index
    %c0_7 = arith.constant 0 : index
    %8 = vector.load %arg7[%c0_6, %c0_7] : memref<16x96xf32, #tpu.memory_space<vmem>>, vector<16x96xf32>
    tpu.vector_store %arg7[%c0_6, %c0_7], %7 {strides = array<i32>} : memref<16x96xf32, #tpu.memory_space<vmem>>, vector<16x96xf32>,
    %c0_i32_8 = arith.constant 0 : i32
    %9 = arith.cmpi eq, %arg2, %c0_i32_8 : i32
    %10 = arith.extui %9 : i1 to i32
    %c0_i32_9 = arith.constant 0 : i32
    %11 = arith.cmpi ne, %10, %c0_i32_9 : i32
    scf.if %11 {
      %c0_10 = arith.constant 0 : index
      %c0_11 = arith.constant 0 : index
      %12 = vector.load %arg7[%c0_10, %c0_11] : memref<16x96xf32, #tpu.memory_space<vmem>>, vector<16x96xf32>
      %c0_12 = arith.constant 0 : index
      %c0_13 = arith.constant 0 : index
      %13 = vector.load %arg5[%c0_12, %c0_13] : memref<1x96xf32, #tpu.memory_space<vmem>>, vector<1x96xf32>
      %14 = vector.broadcast %13 : vector<1x96xf32> to vector<16x96xf32>
      %15 = arith.addf %12, %14 : vector<16x96xf32>
      %16 = arith.truncf %15 : vector<16x96xf32> to vector<16x96xbf16>
      %c0_14 = arith.constant 0 : index
      %c0_15 = arith.constant 0 : index
      %17 = vector.load %arg6[%c0_14, %c0_15] : memref<16x96xbf16, #tpu.memory_space<vmem>>, vector<16x96xbf16>
      tpu.vector_store %arg6[%c0_14, %c0_15], %16 {strides = array<i32>} : memref<16x96xbf16, #tpu.memory_space<vmem>>, vector<16x96xbf16>,
    } else {
    }
    return
  }
  func.func @transform_0(%arg0: i32, %arg1: i32, %arg2: i32) -> (i32, i32) {
    %c0_i32 = arith.constant 0 : i32
    return %arg0, %arg2 : i32, i32
  }
  func.func @transform_1(%arg0: i32, %arg1: i32, %arg2: i32) -> (i32, i32) {
    %c0_i32 = arith.constant 0 : i32
    return %arg2, %arg1 : i32, i32
  }
  func.func @transform_2(%arg0: i32, %arg1: i32, %arg2: i32) -> (i32, i32) {
    %c0_i32 = arith.constant 0 : i32
    %c0_i32_0 = arith.constant 0 : i32
    return %c0_i32, %arg1 : i32, i32
  }
  func.func @transform_3(%arg0: i32, %arg1: i32, %arg2: i32) -> (i32, i32) {
    %c0_i32 = arith.constant 0 : i32
    return %arg0, %arg1 : i32, i32
  }
}

</mosaic_0001>

<bundles_post_ra>
// kernel: tpu_custom_call.1
= control target key start
LH: loop header
LB: loop body
LE: loop exit
PB: predicated region body
PF: predicated region fallthrough
CT: control target
= control target key end

     0   :  { %8 = vsyncpa [#allocation4], 0  ;;  %s350_s0 = inlined_call_operand.hbm [shape: bf16[16,32], index: 0, kind: input, shape index: {}]   ;;  %s351_s1 = inlined_call_operand.hbm [shape: bf16[32,96], index: 1, kind: input, shape index: {}]   ;;  %s352_s2 = inlined_call_operand.vmem [shape: f32[1,96], index: 2, kind: input, shape index: {}]   ;;  %s353_s3 = inlined_call_operand.hbm [shape: bf16[16,96], index: 3, kind: output, shape index: {}]  }
   0x1   :  { %9 = vsyncpa [#allocation7], 0 }
   0x2   :  { %10 = vsyncpa [#allocation5], 0  ;;  %s271_s12 = smov [#allocation3]   ;;  %s199_s16 = scalar_lea.hbm %s350_s0, 128 }
   0x3   :  { %s16_s13 = sshll.u32 %s271_s12, 4  ;;  %p200_p0 = scmp.ne.s32.totalorder %s350_s0, %s199_s16  ;;  %s17_s13 = int_to_ptr.vmem [resolvable:$true] %s16_s13 }
   0x4   :  { %p203_p1 = scmp.lt.u32.totalorder %s199_s16, %s350_s0 }
   0x6   :  { %p205_p2 = pnand %p203_p1, %p200_p0 }
   0x8   :  { %208 = shalt.err (!%p205_p2)
}
   0x9   :  { %s209_s21 = scalar_lea.vmem %s17_s13, 128  ;;  %p214_p4 = scmp.lt.s32.totalorder %s17_s13, %s17_s13 }
   0xa   :  { %p210_p3 = scmp.ne.s32.totalorder %s17_s13, %s209_s21  ;;  %p215_p5 = scmp.lt.s32.totalorder %s209_s21, %s209_s21 }
   0xc   :  { %p216_p6 = por %p215_p5, %p214_p4 }
   0xe   :  { %p217_p7 = pnand %p216_p6, %p210_p3 }
  0x10   :  { %220 = shalt.err (!%p217_p7)
}
  0x11   :  { %s272_s22 = smov 64   ;;  %s273_s23 = smov 4  }
  0x12   :  { %22 = dma.hbm_to_vmem [thread:$0]  %s350_s0, 128, %s17_s13, [#allocation4], %s272_s22, %s272_s22, %s273_s23  }
  0x13   :  { %s274_s26 = smov [#allocation6]   ;;  %s221_s30 = scalar_lea.hbm %s351_s1, 256 }
  0x14   :  { %s28_s27 = sshll.u32 %s274_s26, 4  ;;  %p222_p8 = scmp.ne.s32.totalorder %s351_s1, %s221_s30  ;;  %s29_s27 = int_to_ptr.vmem [resolvable:$true] %s28_s27 }
  0x15   :  { %p225_p9 = scmp.lt.u32.totalorder %s221_s30, %s351_s1 }
  0x17   :  { %p227_p10 = pnand %p225_p9, %p222_p8 }
  0x19   :  { %230 = shalt.err (!%p227_p10)
}
  0x1a   :  { %s231_s8 = scalar_lea.vmem %s29_s27, 256  ;;  %p236_p12 = scmp.lt.s32.totalorder %s29_s27, %s29_s27 }
  0x1b   :  { %p232_p11 = scmp.ne.s32.totalorder %s29_s27, %s231_s8  ;;  %p237_p13 = scmp.lt.s32.totalorder %s231_s8, %s231_s8 }
  0x1d   :  { %p238_p0 = por %p237_p13, %p236_p12 }
  0x1f   :  { %p239_p1 = pnand %p238_p0, %p232_p11 }
  0x21   :  { %242 = shalt.err (!%p239_p1)
}
  0x22   :  { %34 = dma.hbm_to_vmem [thread:$0]  %s351_s1, 256, %s29_s27, [#allocation7], %s272_s22, %s272_s22, %s273_s23  }
  0x23   :  { %265 = dma.done.wait [#allocation4], 128  }
  0x24   :  { %266 = vsyncadd [#allocation4], 4294967168 }
  0x25   :  { %267 = dma.done.wait [#allocation7], 256  }
  0x26   :  { %268 = vsyncadd [#allocation7], 4294967040  ;;  %vm48_vm0 = vcmask 785408   ;;  %v275_v0 = vmov 0.0   ;;  %vm276_vm1 = vmmov 0   ;;  %v196_v1 = vld [vmem:[#allocation6] sm:$0xff]  }
  0x27   :  { %49 = vst.msk [vmem:[#allocation2] sm:$0xff] %vm48_vm0, %v275_v0  ;;  %50 = vst.msk [vmem:[#allocation2 + $0x8] sm:$0xff] %vm48_vm0, %v275_v0  ;;  %181 = vmatprep.subr.bf16.mxu0 %v275_v0  ;;  %185 = vmatprep.mubr.msk.bf16.mxu0 %vm276_vm1, %v275_v0  ;;  %v197_v2 = vld [vmem:[#allocation6 + $0x8] sm:$0xff]   ;;  %v198_v3 = vld [vmem:[#allocation3] sm:$0xff]   ;;  %vm76_vm2 = vcmask 261120   ;;  %vm148_vm3 = vcmask 781312  }
  0x28   :  { %182 = vmatpush3.bf16.msra.mxu0 %v196_v1  ;;  %v173_v12 = vld [vmem:[%s352_s2] ss:$0 sm:$0xff]  ;;  %s277_s11 = smov [#allocation8]  }
  0x29   :  { %183 = vmatprep.subr.bf16.mxu0 %v275_v0  ;;  %s156_s12 = sshll.u32 %s277_s11, 4  ;;  %s157_s12 = int_to_ptr.vmem [resolvable:$true] %s156_s12 }
  0x2a   :  { %s243_s13 = scalar_lea.vmem %s157_s12, 128  ;;  %p248_p3 = scmp.lt.s32.totalorder %s157_s12, %s157_s12 }
  0x2b   :  { %p244_p2 = scmp.ne.s32.totalorder %s157_s12, %s243_s13  ;;  %p249_p4 = scmp.lt.s32.totalorder %s243_s13, %s243_s13 }
  0x2c   :  { %184 = vmatpush3.bf16.msra.mxu0 %v197_v2 }
  0x2d   :  { %p250_p5 = por %p249_p4, %p248_p3 }
  0x2e   :  { %v51_v4 = vld [vmem:[#allocation2] sm:$0xff]  ;;  %v52_v6 = vld [vmem:[#allocation2 + $0x8] sm:$0xff] }
  0x2f   :  { %186 = vmatmul.mubr.msk.bf16.vlgmr.msra.gmra.mrb[0].mxu0 %vm76_vm2, %v198_v3  ;;  %p251_p6 = pnand %p250_p5, %p244_p2 }
 0x102   :  { %v114_v5 = vpop.f32.mrb[0].mxu0 }
 0x103   :  { %v121_v7 = vadd.f32 %v114_v5, %v51_v4  ;;  %v187_v8 = vpop.f32.mrb[1].mxu0 }
 0x104   :  { %v117_v9 = vpop.f32.mrb[2].mxu0 }
 0x105   :  { %124 = vst.msk [vmem:[#allocation2] sm:$0xff] %vm48_vm0, %v121_v7  ;;  %v122_v10 = vadd.f32 %v117_v9, %v52_v6  ;;  %v188_v11 = vpop.f32.mrb[3].mxu0 }
 0x107   :  { %125 = vst.msk [vmem:[#allocation2 + $0x8] sm:$0xff] %vm48_vm0, %v122_v10 }
 0x10c   :  { %v129_v13 = vld [vmem:[#allocation2] sm:$0xff] }
 0x10d   :  { %v138_v14 = vadd.f32 %v173_v12, %v129_v13 }
 0x10e   :  { %v130_v15 = vld [vmem:[#allocation2 + $0x8] sm:$0xff] }
 0x10f   :  { %v139_v16 = vadd.f32 %v173_v12, %v130_v15  ;;  %v176_v17 = vpack.c.bf16 %v138_v14, %v138_v14 }
 0x111   :  { %v177_v18 = vpack.c.bf16 %v139_v16, %v139_v16  ;;  %149 = vst.msk [vmem:[#allocation8] sm:$0xf] %vm148_vm3, %v176_v17 }
 0x113   :  { %150 = vst.msk [vmem:[#allocation8 + $0x4] sm:$0xf] %vm148_vm3, %v177_v18 }
 0x114   :  { %254 = shalt.err (!%p251_p6)
}
 0x115   :  { %s255_s15 = scalar_lea.hbm %s353_s3, 128 }
 0x116   :  { %p256_p7 = scmp.ne.s32.totalorder %s353_s3, %s255_s15  ;;  %p259_p8 = scmp.lt.u32.totalorder %s255_s15, %s353_s3 }
 0x118   :  { %p261_p9 = pnand %p259_p8, %p256_p7 }
 0x11a   :  { %264 = shalt.err (!%p261_p9)
}
 0x11b   :  { %162 = dma.vmem_to_hbm [thread:$0]  %s157_s12, 128, %s353_s3, [#allocation5], %s272_s22, %s272_s22, %s273_s23  }
 0x11c   :  { %269 = dma.done.wait [#allocation5], 128  }
 0x11d   :  { %270 = vsyncadd [#allocation5], 4294967168 }
 0x11e   :  { %166 = vsyncpa [#allocation4], 1 }
 0x11f   :  { %167 = vsyncpa [#allocation7], 1 }
 0x120   :  { %168 = vsyncpa [#allocation5], 1 }

</bundles_post_ra>
